<compile_context>
chip_gen: v5e
topology: v5e:2x2
jax: 0.10.0
libtpu: 0.0.40
codegen_flags: <defaults>
</compile_context>

<pallas_src>
import functools

import jax
import jax.numpy as jnp
from jax.experimental import pallas as pl
from jax.experimental.pallas import tpu as pltpu


N_EMBD = 128
HIDDEN = 4 * N_EMBD  # 512

# Hard cap on the row tile (see VMEM budget note above; keeps v7x safe).
_MAX_TM = 2048


def _round_up(x, m):
    return ((x + m - 1) // m) * m


def _num_tensorcores_per_chip():
    """Best-effort TensorCore count per chip (2 on v7x, 1 on v5e/v6e).

    Any failure falls back to 1, which only disables the even-step grid tweak
    (never affects correctness)."""
    try:
        info = pltpu.get_tpu_info()
        for attr in ("num_cores", "tensorcore_count", "num_tensorcores"):
            n = getattr(info, attr, None)
            if n:
                return int(n)
    except Exception:
        pass
    try:
        n = getattr(jax.devices()[0], "num_cores", None)
        if n:
            return int(n)
    except Exception:
        pass
    return 1


_NUM_TC = _num_tensorcores_per_chip()


def _choose_row_tile(M, tm_request, num_cores):
    """Pick the row tile.

    As large as requested (amortize the ~0.35 us per-grid-step overhead),
    multiple of 16 (bf16 sublane packing of the in-kernel cast / h tensor),
    clamped to the row count, and -- on multi-TC chips only -- adjusted so the
    grid-step count is a multiple of the TC count so the 'parallel' row axis
    shards evenly (no idle core on v7x)."""
    tm = max(8, min(tm_request, _MAX_TM, M))
    if tm >= 16:
        tm = (tm // 16) * 16          # keep bf16 sublane alignment
    else:
        tm = _round_up(tm, 8)         # tiny-M fallback: f32 sublane minimum

    if num_cores > 1 and M >= num_cores * 256:
        steps = pl.cdiv(M, tm)
        if steps % num_cores != 0:
            target = _round_up(steps, num_cores)
            tm = max(256, _round_up(pl.cdiv(M, target), 16))
    return tm


def _ffn_kernel(x_ref, w1_ref, b1_ref, w2_ref, b2_ref, o_ref):
    # x_ref: (tm, E) f32, w1: (E, H) bf16, b1: (1, H) f32,
    # w2: (H, E) bf16, b2: (1, E) f32, o_ref: (tm, E) f32 (or bf16).
    # Narrow x to bf16 in-kernel (VPU work hidden under the MXU) so the wrapper
    # never makes a separate HBM pass just to cast the activations.
    x = x_ref[...].astype(jnp.bfloat16)
    # First matmul on the MXU: bf16 inputs, f32 accumulation.
    h = jnp.dot(x, w1_ref[...], preferred_element_type=jnp.float32)
    # Bias + ReLU in f32 (VPU), then narrow to bf16 for the second MXU pass.
    h = jnp.maximum(h + b1_ref[...], 0.0).astype(w2_ref.dtype)
    y = jnp.dot(h, w2_ref[...], preferred_element_type=jnp.float32)
    o_ref[...] = (y + b2_ref[...]).astype(o_ref.dtype)


@functools.partial(jax.jit, static_argnames=("tm", "out_dtype"))
def feed_forward(x, w1, b1, w2, b2, *, tm=2048, out_dtype=jnp.float32):
    """x: (B, T, n_embd) float32. Returns (B, T, n_embd) in `out_dtype`.

    Pass w1/w2 already in bfloat16 (pre-cast once, outside the per-call path)
    to avoid a per-call cast; float32 weights are also accepted.
    """
    B, T, E = x.shape
    H = w1.shape[1]
    M = B * T

    # Activations stay f32 on the way in; bf16 narrowing happens in-kernel.
    x2d = x.reshape(M, E)
    w1b = w1 if w1.dtype == jnp.bfloat16 else w1.astype(jnp.bfloat16)
    w2b = w2 if w2.dtype == jnp.bfloat16 else w2.astype(jnp.bfloat16)
    b1_2d = b1.reshape(1, H).astype(jnp.float32)
    b2_2d = b2.reshape(1, E).astype(jnp.float32)

    tm_eff = _choose_row_tile(M, tm, _NUM_TC)
    grid = (pl.cdiv(M, tm_eff),)

    out2d = pl.pallas_call(
        _ffn_kernel,
        out_shape=jax.ShapeDtypeStruct((M, E), out_dtype),
        grid_spec=pltpu.PrefetchScalarGridSpec(
            num_scalar_prefetch=0,
            grid=grid,
            in_specs=[
                pl.BlockSpec((tm_eff, E), lambda i: (i, 0)),   # x tile (f32)
                pl.BlockSpec((E, H), lambda i: (0, 0)),        # W1 (VMEM-resident)
                pl.BlockSpec((1, H), lambda i: (0, 0)),        # b1
                pl.BlockSpec((H, E), lambda i: (0, 0)),        # W2 (VMEM-resident)
                pl.BlockSpec((1, E), lambda i: (0, 0)),        # b2
            ],
            out_specs=pl.BlockSpec((tm_eff, E), lambda i: (i, 0)),
        ),
        compiler_params=pltpu.CompilerParams(
            dimension_semantics=("parallel",),
            # ~11 MiB working set at tm=2048; 32 MiB is safe on v5e/v6e/v7x.
            vmem_limit_bytes=32 * 1024 * 1024,
        ),
    )(x2d, w1b, b1_2d, w2b, b2_2d)

    return out2d.reshape(B, T, E)


def init_params(key, n_embd=N_EMBD):
    """PyTorch nn.Linear default init: U(-1/sqrt(fan_in), 1/sqrt(fan_in))."""
    hidden = 4 * n_embd
    k1, k2, k3, k4 = jax.random.split(key, 4)
    bound1 = 1.0 / (n_embd ** 0.5)
    bound2 = 1.0 / (hidden ** 0.5)
    # Stored as (in, out) so the kernel computes x @ W + b
    # (transpose of PyTorch's (out, in) storage).
    w1 = jax.random.uniform(k1, (n_embd, hidden), jnp.float32, -bound1, bound1)
    b1 = jax.random.uniform(k2, (hidden,), jnp.float32, -bound1, bound1)
    w2 = jax.random.uniform(k3, (hidden, n_embd), jnp.float32, -bound2, bound2)
    b2 = jax.random.uniform(k4, (n_embd,), jnp.float32, -bound2, bound2)
    return w1, b1, w2, b2


if __name__ == "__main__":
    key = jax.random.PRNGKey(0)
    kx, kp = jax.random.split(key)

    B, T = 2, 8  # small batch / sequence; embedding fixed at n_embd=128
    x = jax.random.normal(kx, (B, T, N_EMBD), dtype=jnp.float32)
    w1, b1, w2, b2 = init_params(kp)

    # Pre-cast weights to bf16 ONCE, outside the per-call jitted path
    # (f32 masters are kept only for the reference check below).
    w1b = w1.astype(jnp.bfloat16)
    w2b = w2.astype(jnp.bfloat16)

    out = feed_forward(x, w1b, b1, w2b, b2)
    out = jax.block_until_ready(out)
    assert out.shape == (B, T, N_EMBD)
    assert out.dtype == jnp.float32

    # Reference 1: same bf16-in / f32-accumulate recipe as the kernel (tight).
    x2d = x.reshape(-1, N_EMBD)
    h = jnp.maximum(
        jnp.dot(x2d.astype(jnp.bfloat16), w1b,
                preferred_element_type=jnp.float32) + b1, 0.0)
    ref_bf16 = (jnp.dot(h.astype(jnp.bfloat16), w2b,
                        preferred_element_type=jnp.float32)
                + b2).reshape(B, T, N_EMBD)
    assert jnp.allclose(out, ref_bf16, atol=1e-3, rtol=1e-3)

    # Reference 2: full-f32 math (loose tolerance; bf16 operands ~1e-2 rel err).
    ref_f32 = (jnp.maximum(x2d @ w1 + b1, 0.0) @ w2 + b2).reshape(B, T, N_EMBD)
    assert jnp.allclose(out, ref_f32, atol=5e-2, rtol=5e-2)

    print("KERNEL_OK")
</pallas_src>

<mosaic_0001>
module attributes {stable_mosaic.version = 11 : i64} {
  func.func @_ffn_kernel(%arg0: i32, %arg1: memref<16x128xf32, #tpu.memory_space<vmem>>, %arg2: memref<128x512xbf16, #tpu.memory_space<vmem>>, %arg3: memref<1x512xf32, #tpu.memory_space<vmem>>, %arg4: memref<512x128xbf16, #tpu.memory_space<vmem>>, %arg5: memref<1x128xf32, #tpu.memory_space<vmem>>, %arg6: memref<16x128xf32, #tpu.memory_space<vmem>>) attributes {dimension_semantics = [#tpu.dimension_semantics<parallel>], iteration_bounds = array<i64: 1>, scalar_prefetch = 0 : i64, scratch_operands = 0 : i64, tpu.core_type = #tpu.core_type<tc>, window_params = [{transform_indices = @transform_0, window_bounds = array<i64: 16, 128>}, {pipeline_mode = #tpu.pipeline_mode<synchronous>, transform_indices = @transform_1, window_bounds = array<i64: 128, 512>}, {pipeline_mode = #tpu.pipeline_mode<synchronous>, transform_indices = @transform_2, window_bounds = array<i64: 1, 512>}, {pipeline_mode = #tpu.pipeline_mode<synchronous>, transform_indices = @transform_3, window_bounds = array<i64: 512, 128>}, {pipeline_mode = #tpu.pipeline_mode<synchronous>, transform_indices = @transform_4, window_bounds = array<i64: 1, 128>}, {transform_indices = @transform_5, window_bounds = array<i64: 16, 128>}]} {
    %c0 = arith.constant 0 : index
    %c0_0 = arith.constant 0 : index
    %0 = vector.load %arg1[%c0, %c0_0] : memref<16x128xf32, #tpu.memory_space<vmem>>, vector<16x128xf32>
    %1 = arith.truncf %0 : vector<16x128xf32> to vector<16x128xbf16>
    %c0_1 = arith.constant 0 : index
    %c0_2 = arith.constant 0 : index
    %2 = vector.load %arg2[%c0_1, %c0_2] : memref<128x512xbf16, #tpu.memory_space<vmem>>, vector<128x512xbf16>
    %cst = arith.constant dense<0.000000e+00> : vector<16x512xf32>
    %3 = tpu.matmul %1, %2, %cst {dimension_numbers = #tpu.dot_dimension_numbers<[1], [0], [0], [1], [0, 0, 1, 1], [], []>} : vector<16x128xbf16>, vector<128x512xbf16>, vector<16x512xf32> -> vector<16x512xf32>
    %c0_3 = arith.constant 0 : index
    %c0_4 = arith.constant 0 : index
    %4 = vector.load %arg3[%c0_3, %c0_4] : memref<1x512xf32, #tpu.memory_space<vmem>>, vector<1x512xf32>
    %5 = vector.broadcast %4 : vector<1x512xf32> to vector<16x512xf32>
    %6 = arith.addf %3, %5 : vector<16x512xf32>
    %cst_5 = arith.constant 0.000000e+00 : f32
    %7 = vector.broadcast %cst_5 : f32 to vector<16x512xf32>
    %8 = arith.maximumf %6, %7 : vector<16x512xf32>
    %9 = arith.truncf %8 : vector<16x512xf32> to vector<16x512xbf16>
    %c0_6 = arith.constant 0 : index
    %c0_7 = arith.constant 0 : index
    %10 = vector.load %arg4[%c0_6, %c0_7] : memref<512x128xbf16, #tpu.memory_space<vmem>>, vector<512x128xbf16>
    %cst_8 = arith.constant dense<0.000000e+00> : vector<16x128xf32>
    %11 = tpu.matmul %9, %10, %cst_8 {dimension_numbers = #tpu.dot_dimension_numbers<[1], [0], [0], [1], [0, 0, 1, 1], [], []>} : vector<16x512xbf16>, vector<512x128xbf16>, vector<16x128xf32> -> vector<16x128xf32>
    %c0_9 = arith.constant 0 : index
    %c0_10 = arith.constant 0 : index
    %12 = vector.load %arg5[%c0_9, %c0_10] : memref<1x128xf32, #tpu.memory_space<vmem>>, vector<1x128xf32>
    %13 = vector.broadcast %12 : vector<1x128xf32> to vector<16x128xf32>
    %14 = arith.addf %11, %13 : vector<16x128xf32>
    %c0_11 = arith.constant 0 : index
    %c0_12 = arith.constant 0 : index
    %15 = vector.load %arg6[%c0_11, %c0_12] : memref<16x128xf32, #tpu.memory_space<vmem>>, vector<16x128xf32>
    tpu.vector_store %arg6[%c0_11, %c0_12], %14 {strides = array<i32>} : memref<16x128xf32, #tpu.memory_space<vmem>>, vector<16x128xf32>,
    return
  }
  func.func @transform_0(%arg0: i32) -> (i32, i32) {
    %c0_i32 = arith.constant 0 : i32
    %c0_i32_0 = arith.constant 0 : i32
    return %arg0, %c0_i32 : i32, i32
  }
  func.func @transform_1(%arg0: i32) -> (i32, i32) {
    %c0_i32 = arith.constant 0 : i32
    %c0_i32_0 = arith.constant 0 : i32
    %c0_i32_1 = arith.constant 0 : i32
    return %c0_i32, %c0_i32_0 : i32, i32
  }
  func.func @transform_2(%arg0: i32) -> (i32, i32) {
    %c0_i32 = arith.constant 0 : i32
    %c0_i32_0 = arith.constant 0 : i32
    %c0_i32_1 = arith.constant 0 : i32
    return %c0_i32, %c0_i32_0 : i32, i32
  }
  func.func @transform_3(%arg0: i32) -> (i32, i32) {
    %c0_i32 = arith.constant 0 : i32
    %c0_i32_0 = arith.constant 0 : i32
    %c0_i32_1 = arith.constant 0 : i32
    return %c0_i32, %c0_i32_0 : i32, i32
  }
  func.func @transform_4(%arg0: i32) -> (i32, i32) {
    %c0_i32 = arith.constant 0 : i32
    %c0_i32_0 = arith.constant 0 : i32
    %c0_i32_1 = arith.constant 0 : i32
    return %c0_i32, %c0_i32_0 : i32, i32
  }
  func.func @transform_5(%arg0: i32) -> (i32, i32) {
    %c0_i32 = arith.constant 0 : i32
    %c0_i32_0 = arith.constant 0 : i32
    return %arg0, %c0_i32 : i32, i32
  }
}

</mosaic_0001>

<bundles_post_ra>
// kernel: feed_forward.1
= control target key start
LH: loop header
LB: loop body
LE: loop exit
PB: predicated region body
PF: predicated region fallthrough
CT: control target
= control target key end

     0   :  { %10 = vsyncpa [#allocation3], 0  ;;  %s1176_s0 = inlined_call_operand.hbm [shape: f32[16,128], index: 0, kind: input, shape index: {}]   ;;  %s1177_s1 = inlined_call_operand.hbm [shape: bf16[128,512], index: 1, kind: input, shape index: {}]   ;;  %s1178_s2 = inlined_call_operand.vmem [shape: f32[1,512], index: 2, kind: input, shape index: {}]   ;;  %s1179_s3 = inlined_call_operand.hbm [shape: bf16[512,128], index: 3, kind: input, shape index: {}]   ;;  %s1180_s4 = inlined_call_operand.vmem [shape: f32[1,128], index: 4, kind: input, shape index: {}]   ;;  %s1181_s5 = inlined_call_operand.hbm [shape: f32[16,128], index: 5, kind: output, shape index: {}]  }
   0x1   :  { %11 = vsyncpa [#allocation6], 0  ;;  %s30_s20 = sshll.u32 %s1177_s1, 4  ;;  %s31_s20 = int_to_ptr.hbm [resolvable:$true] %s30_s20 }
   0x2   :  { %12 = vsyncpa [#allocation4], 0  ;;  %s1112_s21 = smov [#allocation5]   ;;  %s17_s25 = sshll.u32 %s1176_s0, 4  ;;  %s18_s25 = int_to_ptr.hbm [resolvable:$true] %s17_s25 }
   0x3   :  { %s32_s22 = sshll.u32 %s1112_s21, 4  ;;  %s1113_s26 = smov 256   ;;  %s33_s22 = int_to_ptr.vmem [resolvable:$true] %s32_s22 }
   0x4   :  { %s1114_s27 = smov 16   ;;  %s1115_s28 = smov [#allocation2]  }
   0x5   :  { %38 = dma.hbm_to_vmem [thread:$0]  %s31_s20, 4096, %s33_s22, [#allocation6], %s1113_s26, %s1113_s26, %s1114_s27  }
   0x6   :  { %s19_s29 = sshll.u32 %s1115_s28, 4  ;;  %s1116_s30 = smov 128   ;;  %s20_s29 = int_to_ptr.vmem [resolvable:$true] %s19_s29 }
   0x7   :  { %s1117_s6 = smov 8   ;;  %s45_s8 = sshll.u32 %s1179_s3, 4  ;;  %s46_s8 = int_to_ptr.hbm [resolvable:$true] %s45_s8 }
   0x8   :  { %25 = dma.hbm_to_vmem [thread:$0]  %s18_s25, 256, %s20_s29, [#allocation3], %s1116_s30, %s1116_s30, %s1117_s6  }
   0x9   :  { %s1118_s9 = smov [#allocation7]   ;;  %s1119_s10 = smov 64  }
   0xa   :  { %s47_s0 = sshll.u32 %s1118_s9, 4  ;;  %s1120_s11 = smov 4   ;;  %s48_s0 = int_to_ptr.vmem [resolvable:$true] %s47_s0 }
   0xb   :  { %53 = dma.hbm_to_vmem [thread:$0]  %s46_s8, 4096, %s48_s0, [#allocation6], %s1119_s10, %s1119_s10, %s1120_s11  }
   0xc   :  { %1106 = dma.done.wait [#allocation3], 256  }
   0xd   :  { %1107 = vsyncadd [#allocation3], 4294967040 }
   0xe   :  { %1108 = dma.done.wait [#allocation6], 8192  }
   0xf   :  { %1109 = vsyncadd [#allocation6], 4294959104  ;;  %v793_v0 = vld [vmem:[#allocation5 + $0xe0] sm:$0xf]  ;;  %v965_v1 = vld [vmem:[#allocation5 + $0xec] sm:$0xf0] }
  0x10   :  { %v963_v2 = vld [vmem:[#allocation5 + $0xe4] sm:$0xf]  ;;  %v794_v3 = vor.u32 %v965_v1, %v793_v0  ;;  %v795_v4 = vld [vmem:[#allocation5 + $0xf0] sm:$0xf0]  ;;  %v801_v5 = vld [vmem:[#allocation5 + $0xe8] sm:$0xf] }
  0x11   :  { %v966_v6 = vld [vmem:[#allocation5 + $0xf4] sm:$0xf0]  ;;  %v798_v7 = vor.u32 %v963_v2, %v795_v4  ;;  %v964_v9 = vld [vmem:[#allocation5 + $0xec] sm:$0xf]  ;;  %v803_v10 = vld [vmem:[#allocation5 + $0xf8] sm:$0xf0] }
  0x12   :  { %v802_v8 = vor.u32 %v966_v6, %v801_v5  ;;  %v777_v11 = vld [vmem:[#allocation5 + $0xc0] sm:$0xf]  ;;  %273 = vmatpush.bf16.msra.mxu0 %v794_v3  ;;  %v806_v12 = vor.u32 %v964_v9, %v803_v10  ;;  %v961_v13 = vld [vmem:[#allocation5 + $0xcc] sm:$0xf0]  ;;  %v959_v14 = vld [vmem:[#allocation5 + $0xc4] sm:$0xf] }
  0x13   :  { %v779_v15 = vld [vmem:[#allocation5 + $0xd0] sm:$0xf0]  ;;  %287 = vmatpush.bf16.msra.mxu1 %v798_v7  ;;  %v778_v16 = vor.u32 %v961_v13, %v777_v11  ;;  %v785_v18 = vld [vmem:[#allocation5 + $0xc8] sm:$0xf]  ;;  %v962_v19 = vld [vmem:[#allocation5 + $0xd4] sm:$0xf0] }
  0x14   :  { %301 = vmatpush.bf16.msra.mxu2 %v802_v8  ;;  %v782_v17 = vor.u32 %v959_v14, %v779_v15  ;;  %v960_v20 = vld [vmem:[#allocation5 + $0xcc] sm:$0xf]  ;;  %315 = vmatpush.bf16.msra.mxu3 %v806_v12  ;;  %v786_v21 = vor.u32 %v962_v19, %v785_v18  ;;  %v787_v22 = vld [vmem:[#allocation5 + $0xd8] sm:$0xf0]  ;;  %v761_v23 = vld [vmem:[#allocation5 + $0xa0] sm:$0xf] }
  0x15   :  { %v957_v24 = vld [vmem:[#allocation5 + $0xac] sm:$0xf0]  ;;  %v790_v25 = vor.u32 %v960_v20, %v787_v22  ;;  %v955_v26 = vld [vmem:[#allocation5 + $0xa4] sm:$0xf]  ;;  %v763_v27 = vld [vmem:[#allocation5 + $0xb0] sm:$0xf0] }
  0x16   :  { %v769_v28 = vld [vmem:[#allocation5 + $0xa8] sm:$0xf]  ;;  %274 = vmatpush.bf16.msra.mxu0 %v778_v16  ;;  %v762_v29 = vor.u32 %v957_v24, %v761_v23  ;;  %v958_v30 = vld [vmem:[#allocation5 + $0xb4] sm:$0xf0]  ;;  %v956_v31 = vld [vmem:[#allocation5 + $0xac] sm:$0xf]  ;;  %v766_v33 = vor.u32 %v955_v26, %v763_v27 }
  0x17   :  { %v771_v32 = vld [vmem:[#allocation5 + $0xb8] sm:$0xf0]  ;;  %288 = vmatpush.bf16.msra.mxu1 %v782_v17  ;;  %v770_v34 = vor.u32 %v958_v30, %v769_v28  ;;  %v745_v35 = vld [vmem:[#allocation5 + $0x80] sm:$0xf]  ;;  %v953_v36 = vld [vmem:[#allocation5 + $0x8c] sm:$0xf0] }
  0x18   :  { %302 = vmatpush.bf16.msra.mxu2 %v786_v21  ;;  %v951_v37 = vld [vmem:[#allocation5 + $0x84] sm:$0xf]  ;;  %316 = vmatpush.bf16.msra.mxu3 %v790_v25  ;;  %v774_v38 = vor.u32 %v956_v31, %v771_v32  ;;  %v747_v39 = vld [vmem:[#allocation5 + $0x90] sm:$0xf0]  ;;  %v753_v40 = vld [vmem:[#allocation5 + $0x88] sm:$0xf]  ;;  %v746_v44 = vor.u32 %v953_v36, %v745_v35 }
  0x19   :  { %v954_v41 = vld [vmem:[#allocation5 + $0x94] sm:$0xf0]  ;;  %v952_v42 = vld [vmem:[#allocation5 + $0x8c] sm:$0xf]  ;;  %v755_v43 = vld [vmem:[#allocation5 + $0x98] sm:$0xf0]  ;;  %v750_v45 = vor.u32 %v951_v37, %v747_v39 }
  0x1a   :  { %275 = vmatpush.bf16.msra.mxu0 %v762_v29  ;;  %v754_v46 = vor.u32 %v954_v41, %v753_v40  ;;  %v729_v47 = vld [vmem:[#allocation5 + $0x60] sm:$0xf]  ;;  %v949_v48 = vld [vmem:[#allocation5 + $0x6c] sm:$0xf0]  ;;  %v947_v49 = vld [vmem:[#allocation5 + $0x64] sm:$0xf]  ;;  %v758_v50 = vor.u32 %v952_v42, %v755_v43 }
  0x1b   :  { %289 = vmatpush.bf16.msra.mxu1 %v766_v33  ;;  %v731_v51 = vld [vmem:[#allocation5 + $0x70] sm:$0xf0]  ;;  %v737_v52 = vld [vmem:[#allocation5 + $0x68] sm:$0xf]  ;;  %v950_v53 = vld [vmem:[#allocation5 + $0x74] sm:$0xf0]  ;;  %v730_v56 = vor.u32 %v949_v48, %v729_v47 }
  0x1c   :  { %303 = vmatpush.bf16.msra.mxu2 %v770_v34  ;;  %317 = vmatpush.bf16.msra.mxu3 %v774_v38  ;;  %v948_v54 = vld [vmem:[#allocation5 + $0x6c] sm:$0xf]  ;;  %v739_v55 = vld [vmem:[#allocation5 + $0x78] sm:$0xf0]  ;;  %v734_v57 = vor.u32 %v947_v49, %v731_v51  ;;  %v738_v58 = vor.u32 %v950_v53, %v737_v52  ;;  %v713_v59 = vld [vmem:[#allocation5 + $0x40] sm:$0xf] }
  0x1d   :  { %v945_v60 = vld [vmem:[#allocation5 + $0x4c] sm:$0xf0]  ;;  %v943_v61 = vld [vmem:[#allocation5 + $0x44] sm:$0xf]  ;;  %v742_v62 = vor.u32 %v948_v54, %v739_v55  ;;  %v715_v63 = vld [vmem:[#allocation5 + $0x50] sm:$0xf0] }
  0x1e   :  { %276 = vmatpush.bf16.msra.mxu0 %v746_v44  ;;  %v721_v0 = vld [vmem:[#allocation5 + $0x48] sm:$0xf]  ;;  %v946_v1 = vld [vmem:[#allocation5 + $0x54] sm:$0xf0]  ;;  %v944_v2 = vld [vmem:[#allocation5 + $0x4c] sm:$0xf]  ;;  %v714_v4 = vor.u32 %v945_v60, %v713_v59  ;;  %v718_v5 = vor.u32 %v943_v61, %v715_v63 }
  0x1f   :  { %290 = vmatpush.bf16.msra.mxu1 %v750_v45  ;;  %v723_v3 = vld [vmem:[#allocation5 + $0x58] sm:$0xf0]  ;;  %v722_v6 = vor.u32 %v946_v1, %v721_v0  ;;  %v697_v7 = vld [vmem:[#allocation5 + $0x20] sm:$0xf]  ;;  %v941_v8 = vld [vmem:[#allocation5 + $0x2c] sm:$0xf0] }
  0x20   :  { %304 = vmatpush.bf16.msra.mxu2 %v754_v46  ;;  %318 = vmatpush.bf16.msra.mxu3 %v758_v50  ;;  %v939_v9 = vld [vmem:[#allocation5 + $0x24] sm:$0xf]  ;;  %v726_v10 = vor.u32 %v944_v2, %v723_v3  ;;  %v699_v11 = vld [vmem:[#allocation5 + $0x30] sm:$0xf0]  ;;  %v705_v12 = vld [vmem:[#allocation5 + $0x28] sm:$0xf]  ;;  %v698_v16 = vor.u32 %v941_v8, %v697_v7 }
  0x21   :  { %v942_v13 = vld [vmem:[#allocation5 + $0x34] sm:$0xf0]  ;;  %v940_v14 = vld [vmem:[#allocation5 + $0x2c] sm:$0xf]  ;;  %v707_v15 = vld [vmem:[#allocation5 + $0x38] sm:$0xf0]  ;;  %v702_v17 = vor.u32 %v939_v9, %v699_v11 }
  0x22   :  { %277 = vmatpush.bf16.msra.mxu0 %v730_v56  ;;  %v706_v18 = vor.u32 %v942_v13, %v705_v12  ;;  %v681_v19 = vld [vmem:[#allocation5] sm:$0xf]  ;;  %v937_v20 = vld [vmem:[#allocation5 + $0xc] sm:$0xf0]  ;;  %v935_v21 = vld [vmem:[#allocation5 + $0x4] sm:$0xf]  ;;  %v710_v22 = vor.u32 %v940_v14, %v707_v15 }
  0x23   :  { %291 = vmatpush.bf16.msra.mxu1 %v734_v57  ;;  %v683_v23 = vld [vmem:[#allocation5 + $0x10] sm:$0xf0]  ;;  %v689_v24 = vld [vmem:[#allocation5 + $0x8] sm:$0xf]  ;;  %v938_v25 = vld [vmem:[#allocation5 + $0x14] sm:$0xf0]  ;;  %v682_v28 = vor.u32 %v937_v20, %v681_v19 }
  0x24   :  { %305 = vmatpush.bf16.msra.mxu2 %v738_v58  ;;  %319 = vmatpush.bf16.msra.mxu3 %v742_v62  ;;  %v936_v26 = vld [vmem:[#allocation5 + $0xc] sm:$0xf]  ;;  %v691_v27 = vld [vmem:[#allocation5 + $0x18] sm:$0xf0]  ;;  %v68_v29 = vld [vmem:[#allocation2] sm:$0xff]  ;;  %v686_v31 = vor.u32 %v935_v21, %v683_v23  ;;  %v690_v32 = vor.u32 %v938_v25, %v689_v24  ;;  %s1121_s14 = smov [#allocation8]  }
  0x25   :  { %v69_v30 = vld [vmem:[#allocation2 + $0x8] sm:$0xff]  ;;  %v694_v33 = vor.u32 %v936_v26, %v691_v27  ;;  %v973_v38 = vld [vmem:[#allocation7 + $0x30] sm:$0xff]  ;;  %v972_v42 = vld [vmem:[#allocation7 + $0x28] sm:$0xff]  ;;  %s663_s15 = sshll.u32 %s1121_s14, 4  ;;  %s665_s18 = sshll.u32 %s1181_s5, 4  ;;  %s664_s15 = int_to_ptr.vmem [resolvable:$true] %s663_s15  ;;  %s666_s18 = int_to_ptr.hbm [resolvable:$true] %s665_s18 }
  0x26   :  { %278 = vmatpush.bf16.msra.mxu0 %v714_v4  ;;  %v974_v34 = vld [vmem:[#allocation7 + $0x38] sm:$0xff]  ;;  %v70_v35 = vpack.c.bf16 %v69_v30, %v68_v29  ;;  %v981_v40 = vld [vmem:[#allocation7 + $0x70] sm:$0xff]  ;;  %v980_v44 = vld [vmem:[#allocation7 + $0x68] sm:$0xff] }
  0x27   :  { %292 = vmatpush.bf16.msra.mxu1 %v718_v5  ;;  %v982_v36 = vld [vmem:[#allocation7 + $0x78] sm:$0xff]  ;;  %v989_v41 = vld [vmem:[#allocation7 + $0xb0] sm:$0xff]  ;;  %v988_v45 = vld [vmem:[#allocation7 + $0xa8] sm:$0xff] }
  0x28   :  { %306 = vmatpush.bf16.msra.mxu2 %v722_v6  ;;  %320 = vmatpush.bf16.msra.mxu3 %v726_v10  ;;  %v990_v37 = vld [vmem:[#allocation7 + $0xb8] sm:$0xff]  ;;  %v997_v43 = vld [vmem:[#allocation7 + $0xf0] sm:$0xff]  ;;  %v971_v46 = vld [vmem:[#allocation7 + $0x20] sm:$0xff] }
  0x29   :  { %v998_v39 = vld [vmem:[#allocation7 + $0xf8] sm:$0xff]  ;;  %v996_v47 = vld [vmem:[#allocation7 + $0xe8] sm:$0xff]  ;;  %v979_v48 = vld [vmem:[#allocation7 + $0x60] sm:$0xff] }
  0x2a   :  { %279 = vmatpush.bf16.msra.mxu0 %v698_v16  ;;  %v970_v49 = vld [vmem:[#allocation7 + $0x18] sm:$0xff]  ;;  %v987_v51 = vld [vmem:[#allocation7 + $0xa0] sm:$0xff]  ;;  %v969_v53 = vld [vmem:[#allocation7 + $0x10] sm:$0xff] }
  0x2b   :  { %293 = vmatpush.bf16.msra.mxu1 %v702_v17  ;;  %v978_v50 = vld [vmem:[#allocation7 + $0x58] sm:$0xff]  ;;  %v995_v52 = vld [vmem:[#allocation7 + $0xe0] sm:$0xff]  ;;  %v977_v54 = vld [vmem:[#allocation7 + $0x50] sm:$0xff] }
  0x2c   :  { %307 = vmatpush.bf16.msra.mxu2 %v706_v18  ;;  %321 = vmatpush.bf16.msra.mxu3 %v710_v22  ;;  %v986_v55 = vld [vmem:[#allocation7 + $0x98] sm:$0xff]  ;;  %v968_v57 = vld [vmem:[#allocation7 + $0x8] sm:$0xff]  ;;  %v985_v59 = vld [vmem:[#allocation7 + $0x90] sm:$0xff] }
  0x2d   :  { %v994_v56 = vld [vmem:[#allocation7 + $0xd8] sm:$0xff]  ;;  %v976_v58 = vld [vmem:[#allocation7 + $0x48] sm:$0xff]  ;;  %v993_v60 = vld [vmem:[#allocation7 + $0xd0] sm:$0xff] }
  0x2e   :  { %280 = vmatpush.bf16.msra.mxu0 %v682_v28  ;;  %v967_v61 = vld [vmem:[#allocation7] sm:$0xff]  ;;  %v984_v63 = vld [vmem:[#allocation7 + $0x88] sm:$0xff]  ;;  %v103_v3 = vld [vmem:[%s1178_s2] sm:$0xf] }
  0x2f   :  { %294 = vmatpush.bf16.msra.mxu1 %v686_v31  ;;  %v975_v62 = vld [vmem:[#allocation7 + $0x40] sm:$0xff]  ;;  %v992_v0 = vld [vmem:[#allocation7 + $0xc8] sm:$0xff]  ;;  %v105_v5 = vperm.slane %v103_v3, 0  ;;  %v106_v7 = vperm.slane %v103_v3, 1  ;;  %v107_v17 = vperm.slane %v103_v3, 2  ;;  %v108_v19 = vperm.slane %v103_v3, 3 }
  0x30   :  { %308 = vmatpush.bf16.msra.mxu2 %v690_v32  ;;  %322 = vmatpush.bf16.msra.mxu3 %v694_v33  ;;  %v983_v1 = vld [vmem:[#allocation7 + $0x80] sm:$0xff] }
  0x31   :  { %281 = vmatmul.bf16.vlgmr.msra.gmra.mxu0 %v70_v35  ;;  %v991_v2 = vld [vmem:[#allocation7 + $0xc0] sm:$0xff] }
  0x32   :  { %601 = vmatpush.bf16.msrb.mxu0 %v974_v34  ;;  %295 = vmatmul.bf16.vlgmr.msra.gmra.mxu1 %v70_v35 }
  0x33   :  { %615 = vmatpush.bf16.msrb.mxu1 %v982_v36  ;;  %309 = vmatmul.bf16.vlgmr.msra.gmra.mxu2 %v70_v35 }
  0x34   :  { %323 = vmatmul.bf16.vlgmr.msra.gmra.mxu3 %v70_v35  ;;  %629 = vmatpush.bf16.msrb.mxu2 %v990_v37  ;;  %v1009_v37 = vld [vmem:[%s1180_s4] ss:$0 sm:$0xff] }
  0x35   :  { %643 = vmatpush.bf16.msrb.mxu3 %v998_v39 }
  0x36   :  { %602 = vmatpush.bf16.msrb.mxu0 %v973_v38 }
  0x37   :  { %616 = vmatpush.bf16.msrb.mxu1 %v981_v40 }
  0x38   :  { %630 = vmatpush.bf16.msrb.mxu2 %v989_v41 }
  0x39   :  { %644 = vmatpush.bf16.msrb.mxu3 %v997_v43 }
  0x3a   :  { %603 = vmatpush.bf16.msrb.mxu0 %v972_v42 }
  0x3b   :  { %617 = vmatpush.bf16.msrb.mxu1 %v980_v44 }
  0x3c   :  { %631 = vmatpush.bf16.msrb.mxu2 %v988_v45 }
  0x3d   :  { %645 = vmatpush.bf16.msrb.mxu3 %v996_v47 }
  0x3e   :  { %604 = vmatpush.bf16.msrb.mxu0 %v971_v46 }
  0x3f   :  { %618 = vmatpush.bf16.msrb.mxu1 %v979_v48 }
  0x40   :  { %632 = vmatpush.bf16.msrb.mxu2 %v987_v51 }
  0x41   :  { %646 = vmatpush.bf16.msrb.mxu3 %v995_v52 }
  0x42   :  { %605 = vmatpush.bf16.msrb.mxu0 %v970_v49 }
  0x43   :  { %619 = vmatpush.bf16.msrb.mxu1 %v978_v50 }
  0x44   :  { %633 = vmatpush.bf16.msrb.mxu2 %v986_v55 }
  0x45   :  { %647 = vmatpush.bf16.msrb.mxu3 %v994_v56 }
  0x46   :  { %606 = vmatpush.bf16.msrb.mxu0 %v969_v53 }
  0x47   :  { %620 = vmatpush.bf16.msrb.mxu1 %v977_v54 }
  0x48   :  { %634 = vmatpush.bf16.msrb.mxu2 %v985_v59 }
  0x49   :  { %648 = vmatpush.bf16.msrb.mxu3 %v993_v60 }
  0x4a   :  { %607 = vmatpush.bf16.msrb.mxu0 %v968_v57 }
  0x4b   :  { %621 = vmatpush.bf16.msrb.mxu1 %v976_v58 }
  0x4c   :  { %635 = vmatpush.bf16.msrb.mxu2 %v984_v63 }
  0x4d   :  { %649 = vmatpush.bf16.msrb.mxu3 %v992_v0 }
  0x4e   :  { %608 = vmatpush.bf16.msrb.mxu0 %v967_v61 }
  0x4f   :  { %622 = vmatpush.bf16.msrb.mxu1 %v975_v62 }
  0x50   :  { %636 = vmatpush.bf16.msrb.mxu2 %v983_v1 }
  0x51   :  { %650 = vmatpush.bf16.msrb.mxu3 %v991_v2 }
  0xae   :  { %v282_v4 = vpop.f32.mrf.mxu0 }
  0xaf   :  { %v296_v6 = vpop.f32.mrf.mxu1  ;;  %v283_v8 = vadd.f32 %v282_v4, %v105_v5 }
  0xb0   :  { %v297_v9 = vadd.f32 %v296_v6, %v106_v7 }
  0xb1   :  { %v329_v13 = vmax.f32 %v283_v8, 0.0 }
  0xb2   :  { %v330_v16 = vmax.f32 %v297_v9, 0.0 }
  0xb6   :  { %v310_v10 = vpop.f32.mrf.mxu2  ;;  %v284_v12 = vpop.f32.mrf.mxu0 }
  0xb7   :  { %v324_v11 = vpop.f32.mrf.mxu3  ;;  %v285_v14 = vadd.f32 %v284_v12, %v105_v5  ;;  %v298_v15 = vpop.f32.mrf.mxu1  ;;  %v311_v23 = vadd.f32 %v310_v10, %v107_v17 }
  0xb8   :  { %v299_v18 = vadd.f32 %v298_v15, %v106_v7  ;;  %v325_v25 = vadd.f32 %v324_v11, %v108_v19 }
  0xb9   :  { %v333_v20 = vmax.f32 %v285_v14, 0.0  ;;  %v331_v30 = vmax.f32 %v311_v23, 0.0 }
  0xba   :  { %v334_v21 = vmax.f32 %v299_v18, 0.0  ;;  %v332_v32 = vmax.f32 %v325_v25, 0.0 }
  0xbb   :  { %v337_v22 = vpack.c.bf16 %v333_v20, %v329_v13 }
  0xbc   :  { %v338_v24 = vpack.c.bf16 %v334_v21, %v330_v16 }
  0xbd   :  { %609 = vmatmul.bf16.vlgmr.msrb.gmra.mxu0 %v337_v22 }
  0xbe   :  { %v312_v26 = vpop.f32.mrf.mxu2  ;;  %623 = vmatmul.bf16.vlgmr.msrb.gmra.mxu1 %v338_v24 }
  0xbf   :  { %v313_v27 = vadd.f32 %v312_v26, %v107_v17  ;;  %v326_v28 = vpop.f32.mrf.mxu3 }
  0xc0   :  { %v327_v29 = vadd.f32 %v326_v28, %v108_v19 }
  0xc1   :  { %v335_v31 = vmax.f32 %v313_v27, 0.0 }
  0xc2   :  { %v336_v33 = vmax.f32 %v327_v29, 0.0 }
  0xc3   :  { %v339_v34 = vpack.c.bf16 %v335_v31, %v331_v30 }
  0xc4   :  { %v340_v35 = vpack.c.bf16 %v336_v33, %v332_v32 }
  0xc5   :  { %637 = vmatmul.bf16.vlgmr.msrb.gmra.mxu2 %v339_v34 }
  0xc6   :  { %651 = vmatmul.bf16.vlgmr.msrb.gmra.mxu3 %v340_v35 }
 0x13a   :  { %v610_v36 = vpop.f32.mrf.mxu0 }
 0x13b   :  { %v611_v38 = vadd.f32 %v1009_v37, %v610_v36  ;;  %v624_v39 = vpop.f32.mrf.mxu1 }
 0x13d   :  { %v625_v40 = vadd.f32 %v624_v39, %v611_v38 }
 0x142   :  { %v612_v41 = vpop.f32.mrf.mxu0 }
 0x143   :  { %v613_v45 = vadd.f32 %v1009_v37, %v612_v41  ;;  %v626_v47 = vpop.f32.mrf.mxu1 }
 0x145   :  { %v627_v48 = vadd.f32 %v626_v47, %v613_v45 }
 0x148   :  { %v638_v42 = vpop.f32.mrf.mxu2 }
 0x149   :  { %v639_v43 = vadd.f32 %v638_v42, %v625_v40  ;;  %v652_v44 = vpop.f32.mrf.mxu3 }
 0x14b   :  { %v653_v46 = vadd.f32 %v652_v44, %v639_v43 }
 0x14d   :  { %657 = vst [vmem:[#allocation8] sm:$0xff] %v653_v46 }
 0x150   :  { %v640_v49 = vpop.f32.mrf.mxu2 }
 0x151   :  { %v641_v50 = vadd.f32 %v640_v49, %v627_v48  ;;  %v654_v51 = vpop.f32.mrf.mxu3 }
 0x153   :  { %v655_v52 = vadd.f32 %v654_v51, %v641_v50 }
 0x155   :  { %658 = vst [vmem:[#allocation8 + $0x8] sm:$0xff] %v655_v52 }
 0x156   :  { %671 = dma.vmem_to_hbm [thread:$0]  %s664_s15, 256, %s666_s18, [#allocation4], %s1116_s30, %s1116_s30, %s1117_s6  }
 0x157   :  { %1110 = dma.done.wait [#allocation4], 256  }
 0x158   :  { %1111 = vsyncadd [#allocation4], 4294967040 }
 0x159   :  { %676 = vsyncpa [#allocation3], 1 }
 0x15a   :  { %677 = vsyncpa [#allocation6], 1 }
 0x15b   :  { %678 = vsyncpa [#allocation4], 1 }

</bundles_post_ra>
